<compile_context>
chip_gen: v7x
topology: tpu7x:2x2x1
jax: 0.10.0
libtpu: 0.0.40
codegen_flags: <defaults>
</compile_context>

<pallas_src>
import jax
import jax.numpy as jnp
from jax.experimental import pallas as pl
from jax.experimental.pallas import tpu as pltpu


# ----------------------------------------------------------------------------
# Per-generation budgets
# ----------------------------------------------------------------------------
def _vmem_capacity_bytes():
    """Physical per-core VMEM, with a conservative (v7x-sized) fallback."""
    try:
        info = pltpu.get_tpu_info()
        for attr in ("vmem_capacity_bytes", "vmem_size_bytes", "vmem_bytes"):
            cap = getattr(info, attr, None)
            if cap:
                return int(cap)
    except Exception:
        pass
    return 64 * 1024 * 1024


def _default_budgets(vmem_cap):
    # Scoped VMEM limit: leave headroom below physical capacity.
    vmem_limit = int(min(96 << 20, max(32 << 20, vmem_cap - (12 << 20))))
    if vmem_cap >= (96 << 20):          # v5e / v6e class (128 MiB VMEM)
        fused_block = 16 << 20          # ~4x (in+out double-buffered) = 64 MiB
        two_pass_block = 8 << 20
    else:                               # v7x class (64 MiB VMEM)
        fused_block = 10 << 20          # ~40 MiB in-flight
        two_pass_block = 5 << 20
    return fused_block, two_pass_block, vmem_limit


# ----------------------------------------------------------------------------
# Fused single-pass kernel: pool + FC + sigmoid + scale for a batch group.
# 2 HBM passes over x (read + write) per element.
# ----------------------------------------------------------------------------
def _make_fused_kernel(batch_group, inv_hw):
    def kernel(x_ref, w1_ref, w2_ref, o_ref, col_ref):
        # x_ref/o_ref: (Bg, C, HW); w1_ref: (Cr, C); w2_ref: (C, Cr) (PyTorch-native)
        # col_ref:     (C, Bg) f32 scratch holding pooled / scale columns.
        #
        # 1) Pool each batch element into a (C, 1) column with an
        #    f32-accumulating reduction — no materialized f32 copy of the tile.
        #    (Static loop is bounded by max_batch_group=8; each iteration's
        #    live state is a single (C, 1) column.)
        for b in range(batch_group):
            col_ref[:, b:b + 1] = (
                jnp.sum(x_ref[b], axis=-1, keepdims=True, dtype=jnp.float32) * inv_hw)

        # 2) Excitation ONCE per grid step, batched over the group, kept in
        #    column form (C on sublanes) so no transposes / relayouts are on
        #    the critical path:  (Cr,C)@(C,Bg) -> relu -> (C,Cr)@(Cr,Bg) -> sigmoid.
        pooled = col_ref[...]                                              # (C, Bg)
        h = jnp.maximum(
            jnp.dot(w1_ref[...], pooled, preferred_element_type=jnp.float32), 0.0)
        col_ref[...] = jax.nn.sigmoid(
            jnp.dot(w2_ref[...], h, preferred_element_type=jnp.float32))   # (C, Bg)

        # 3) Scale: multiply in the storage dtype (cast the tiny (C, 1) scale,
        #    not the tile); each iteration streams load -> mul -> store.
        for b in range(batch_group):
            o_ref[b] = x_ref[b] * col_ref[:, b:b + 1].astype(o_ref.dtype)

    return kernel


def _pick_batch_group(B, per_elem_bytes, cap_bytes, max_group):
    bt = int(max(1, min(B, max_group, cap_bytes // max(per_elem_bytes, 1))))
    # Keep >=2 grid steps (>=4 when possible): "parallel" grid steps are
    # sharded across v7x's two TensorCores; a 1-step grid idles one of them.
    min_steps = 4 if B >= 4 else (2 if B >= 2 else 1)
    bt = min(bt, max(1, B // min_steps))
    while B % bt:
        bt -= 1
    return bt


def _se_fused(x_flat, w1, w2, *, batch_group, vmem_limit_bytes):
    B, C, HW = x_flat.shape
    Cr = w1.shape[0]
    return pl.pallas_call(
        _make_fused_kernel(batch_group, 1.0 / HW),
        out_shape=jax.ShapeDtypeStruct((B, C, HW), x_flat.dtype),
        grid_spec=pltpu.PrefetchScalarGridSpec(
            num_scalar_prefetch=0,
            grid=(B // batch_group,),
            in_specs=[
                pl.BlockSpec((batch_group, C, HW), lambda i: (i, 0, 0)),
                # Constant index_map => weight blocks are revisited, not re-DMA'd.
                pl.BlockSpec((Cr, C), lambda i: (0, 0)),
                pl.BlockSpec((C, Cr), lambda i: (0, 0)),
            ],
            out_specs=pl.BlockSpec((batch_group, C, HW), lambda i: (i, 0, 0)),
            scratch_shapes=[pltpu.VMEM((C, batch_group), jnp.float32)],
        ),
        compiler_params=pltpu.CompilerParams(
            dimension_semantics=("parallel",),
            vmem_limit_bytes=vmem_limit_bytes,
        ),
    )(x_flat, w1, w2)


# ----------------------------------------------------------------------------
# Two-pass path (blocks too big for the fused VMEM budget):
#   pass 1: per-(b, c) spatial sums, HW tiled (reduction axis last, "arbitrary")
#   excite: two tiny matmuls + sigmoid in plain JAX (no extra kernel launch)
#   pass 2: elementwise scale, HW tiled, fully parallel 2-D grid
# ----------------------------------------------------------------------------
def _make_pool_kernel(hw_total, hw_tile, n_hw):
    tail = hw_total - (n_hw - 1) * hw_tile        # valid columns of the last tile
    need_mask = tail != hw_tile

    def kernel(x_ref, sum_ref):
        # x_ref: (C, HWt); sum_ref: (C, 1) f32 accumulator resident across HW axis.
        h = pl.program_id(1)

        @pl.when(h == 0)
        def _():
            sum_ref[...] = jnp.zeros_like(sum_ref)

        if not need_mask:
            sum_ref[...] += jnp.sum(x_ref[...], axis=-1, keepdims=True,
                                    dtype=jnp.float32)
        else:
            # Mask ONLY the last (partial) tile so the mean divisor stays H*W;
            # all full tiles take the cheap unmasked path.
            @pl.when(h != n_hw - 1)
            def _():
                sum_ref[...] += jnp.sum(x_ref[...], axis=-1, keepdims=True,
                                        dtype=jnp.float32)

            @pl.when(h == n_hw - 1)
            def _():
                x = x_ref[...]
                col = jax.lax.broadcasted_iota(jnp.int32, x.shape, 1)
                xm = jnp.where(col < tail, x, jnp.zeros((), x.dtype))
                sum_ref[...] += jnp.sum(xm, axis=-1, keepdims=True,
                                        dtype=jnp.float32)

    return kernel


def _scale_kernel(x_ref, s_ref, o_ref):
    # x_ref/o_ref: (C, HWt); s_ref: (C, 1) in the storage dtype -> broadcast
    # over the HW lanes; multiply runs in the storage dtype (no f32 tile copy).
    o_ref[...] = x_ref[...] * s_ref[...]


def _pick_hw_tile(C, HW, itemsize, cap_bytes):
    """Largest lane-dense HW tile (multiple of 128) under the byte budget, or
    the full HW if it already fits / is small."""
    max_hwt = max(1, cap_bytes // (C * itemsize))
    if HW <= max_hwt or HW <= 128:
        return HW
    return max(128, (max_hwt // 128) * 128)


def _se_two_pass(x_flat, w1, w2, *, block_bytes, vmem_limit_bytes):
    B, C, HW = x_flat.shape
    hw_tile = _pick_hw_tile(C, HW, x_flat.dtype.itemsize, block_bytes)
    n_hw = (HW + hw_tile - 1) // hw_tile

    # Pass 1: pooled spatial sums (B, C, 1), accumulated across the HW grid axis.
    # (For B == 1 on v7x, splitting HW into two parallel partial-sum chunks would
    # engage both TensorCores; left as a follow-up.)
    pooled_sums = pl.pallas_call(
        _make_pool_kernel(HW, hw_tile, n_hw),
        out_shape=jax.ShapeDtypeStruct((B, C, 1), jnp.float32),
        grid_spec=pltpu.PrefetchScalarGridSpec(
            num_scalar_prefetch=0,
            grid=(B, n_hw),
            in_specs=[pl.BlockSpec((None, C, hw_tile), lambda b, h: (b, 0, h))],
            out_specs=pl.BlockSpec((None, C, 1), lambda b, h: (b, 0, 0)),
        ),
        compiler_params=pltpu.CompilerParams(
            dimension_semantics=("parallel", "arbitrary"),
            vmem_limit_bytes=vmem_limit_bytes,
        ),
    )(x_flat)

    # Excitation: two tiny matmuls + sigmoid as plain XLA ops in the wrapper —
    # saves a kernel launch and an HBM round-trip of pooled_sums.
    pooled = pooled_sums.reshape(B, C) * (1.0 / HW)
    hmid = jnp.maximum(
        jnp.einsum("bc,rc->br", pooled, w1, preferred_element_type=jnp.float32), 0.0)
    s = jax.nn.sigmoid(
        jnp.einsum("br,cr->bc", hmid, w2, preferred_element_type=jnp.float32))
    scales = s.astype(x_flat.dtype).reshape(B, C, 1)

    # Pass 2: elementwise scale; fully parallel 2-D grid.
    out_flat = pl.pallas_call(
        _scale_kernel,
        out_shape=jax.ShapeDtypeStruct((B, C, HW), x_flat.dtype),
        grid_spec=pltpu.PrefetchScalarGridSpec(
            num_scalar_prefetch=0,
            grid=(B, n_hw),
            in_specs=[
                pl.BlockSpec((None, C, hw_tile), lambda b, h: (b, 0, h)),
                pl.BlockSpec((None, C, 1), lambda b, h: (b, 0, 0)),
            ],
            out_specs=pl.BlockSpec((None, C, hw_tile), lambda b, h: (b, 0, h)),
        ),
        compiler_params=pltpu.CompilerParams(
            dimension_semantics=("parallel", "parallel"),
            vmem_limit_bytes=vmem_limit_bytes,
        ),
    )(x_flat, scales)
    return out_flat


# ----------------------------------------------------------------------------
# Public wrapper
# ----------------------------------------------------------------------------
def se_layer(
    x,
    w1,
    w2,
    *,
    force_two_pass=False,
    fused_block_bytes=None,       # default derived from detected VMEM capacity
    two_pass_block_bytes=None,    # default derived from detected VMEM capacity
    vmem_limit_bytes=None,        # default derived from detected VMEM capacity
    max_batch_group=8,
):
    """x: (B, C, H, W). w1: (C//r, C), w2: (C, C//r)  (PyTorch nn.Linear.weight layout)."""
    B, C, H, W = x.shape
    Cr, C_in = w1.shape
    assert C_in == C and w2.shape == (C, Cr)
    HW = H * W

    df, dt, dv = _default_budgets(_vmem_capacity_bytes())
    fused_block_bytes = df if fused_block_bytes is None else fused_block_bytes
    two_pass_block_bytes = dt if two_pass_block_bytes is None else two_pass_block_bytes
    vmem_limit_bytes = dv if vmem_limit_bytes is None else vmem_limit_bytes

    x_flat = x.reshape(B, C, HW)
    # NOTE: for small-HW NCHW maps (7x7 / 14x14) the HW lane axis pads to 128
    # and stores are masked; a caller-supplied channel-last (B, HW, C) layout
    # with C % 128 == 0 would be fully lane-dense, but transposing here would
    # cost an extra HBM pass, so it is intentionally not done.
    per_elem_bytes = C * HW * x.dtype.itemsize
    if force_two_pass or per_elem_bytes > fused_block_bytes:
        # Two-pass costs ~1.5x the HBM traffic of fused (3 passes over x vs 2),
        # so it is only used when a fused block cannot fit the VMEM budget.
        out_flat = _se_two_pass(
            x_flat, w1, w2,
            block_bytes=two_pass_block_bytes,
            vmem_limit_bytes=vmem_limit_bytes,
        )
    else:
        batch_group = _pick_batch_group(B, per_elem_bytes, fused_block_bytes,
                                        max_batch_group)
        out_flat = _se_fused(
            x_flat, w1, w2,
            batch_group=batch_group,
            vmem_limit_bytes=vmem_limit_bytes,
        )
    return out_flat.reshape(B, C, H, W)


def se_layer_ref(x, w1, w2):
    """Pure-JAX reference matching the PyTorch forward (native weight layout)."""
    y = jnp.mean(x, axis=(2, 3))                 # (B, C)
    y = jnp.maximum(y @ w1.T, 0.0)               # (B, Cr)
    y = jax.nn.sigmoid(y @ w2.T)                 # (B, C)
    return x * y[:, :, None, None]


if __name__ == "__main__":
    key = jax.random.PRNGKey(0)

    # Case 1: SELayer(channel=16, reduction=4) toy -- fused path; batch_group is
    # capped so the grid has 2 parallel steps (one per v7x TensorCore).
    B, C, H, W = 2, 16, 8, 8
    Cr = C // 4
    kx, k1, k2 = jax.random.split(key, 3)
    x = jax.random.normal(kx, (B, C, H, W), dtype=jnp.float32)
    w1 = jax.random.normal(k1, (Cr, C), dtype=jnp.float32) * (1.0 / jnp.sqrt(C))
    w2 = jax.random.normal(k2, (C, Cr), dtype=jnp.float32) * (1.0 / jnp.sqrt(Cr))

    ref = se_layer_ref(x, w1, w2)
    out_fused = jax.block_until_ready(se_layer(x, w1, w2))
    assert out_fused.shape == (B, C, H, W)
    assert jnp.allclose(out_fused, ref, atol=1e-5, rtol=1e-5), "fused path mismatch"

    # Case 2: fused path with batch grouping (B=8 -> batch_group=2, 4 grid steps)
    # exercising the batched column-form excitation.
    x4 = jax.random.normal(jax.random.PRNGKey(1), (8, C, 4, 4), dtype=jnp.float32)
    ref4 = se_layer_ref(x4, w1, w2)
    out4 = jax.block_until_ready(se_layer(x4, w1, w2))
    assert jnp.allclose(out4, ref4, atol=1e-5, rtol=1e-5), "grouped fused path mismatch"

    # Case 3: same inputs as case 1 through the two-pass (pool / excite / scale) path.
    out_tp = jax.block_until_ready(se_layer(x, w1, w2, force_two_pass=True))
    assert jnp.allclose(out_tp, ref, atol=1e-5, rtol=1e-5), "two-pass path mismatch"

    # Case 4: two-pass with HW tiling and a partial last tile (HW=400, tile=128):
    # exercises the tail-only mask in the pool pass AND the dropped out-of-bounds
    # writes of the partial tile in the scale pass.
    B2, C2, H2, W2 = 2, 8, 20, 20
    Cr2 = C2 // 4
    kx2, k12, k22 = jax.random.split(jax.random.PRNGKey(0), 3)
    x2 = jax.random.normal(kx2, (B2, C2, H2, W2), dtype=jnp.float32)
    w12 = jax.random.normal(k12, (Cr2, C2), dtype=jnp.float32) * (1.0 / jnp.sqrt(C2))
    w22 = jax.random.normal(k22, (C2, Cr2), dtype=jnp.float32) * (1.0 / jnp.sqrt(Cr2))

    out_tiled = jax.block_until_ready(
        se_layer(x2, w12, w22, force_two_pass=True, two_pass_block_bytes=4096)
    )
    ref2 = se_layer_ref(x2, w12, w22)
    assert jnp.allclose(out_tiled, ref2, atol=1e-5, rtol=1e-5), "tiled two-pass mismatch"

    print("KERNEL_OK")
</pallas_src>

<mosaic_0001>
module attributes {stable_mosaic.version = 11 : i64} {
  func.func @kernel(%arg0: i32, %arg1: memref<1x16x64xf32, #tpu.memory_space<vmem>>, %arg2: memref<4x16xf32, #tpu.memory_space<vmem>>, %arg3: memref<16x4xf32, #tpu.memory_space<vmem>>, %arg4: memref<1x16x64xf32, #tpu.memory_space<vmem>>, %arg5: memref<16x1xf32, #tpu.memory_space<vmem>>) attributes {dimension_semantics = [#tpu.dimension_semantics<parallel>], iteration_bounds = array<i64: 2>, scalar_prefetch = 0 : i64, scratch_operands = 1 : i64, tpu.core_type = #tpu.core_type<tc>, window_params = [{transform_indices = @transform_0, window_bounds = array<i64: 1, 16, 64>}, {pipeline_mode = #tpu.pipeline_mode<synchronous>, transform_indices = @transform_1, window_bounds = array<i64: 4, 16>}, {pipeline_mode = #tpu.pipeline_mode<synchronous>, transform_indices = @transform_2, window_bounds = array<i64: 16, 4>}, {transform_indices = @transform_3, window_bounds = array<i64: 1, 16, 64>}]} {
    %c0 = arith.constant 0 : index
    %c0_0 = arith.constant 0 : index
    %c0_1 = arith.constant 0 : index
    %0 = vector.load %arg1[%c0, %c0_0, %c0_1] : memref<1x16x64xf32, #tpu.memory_space<vmem>>, vector<1x16x64xf32>
    %1 = vector.shape_cast %0 : vector<1x16x64xf32> to vector<16x64xf32>
    %cst = arith.constant dense<0.000000e+00> : vector<16xf32>
    %2 = vector.multi_reduction <add>, %1, %cst [1] : vector<16x64xf32> to vector<16xf32>
    %3 = vector.shape_cast %2 : vector<16xf32> to vector<16x1xf32>
    %cst_2 = arith.constant 1.562500e-02 : f32
    %4 = vector.broadcast %cst_2 : f32 to vector<16x1xf32>
    %5 = arith.mulf %3, %4 : vector<16x1xf32>
    %c0_3 = arith.constant 0 : index
    %c0_4 = arith.constant 0 : index
    %6 = vector.load %arg5[%c0_3, %c0_4] : memref<16x1xf32, #tpu.memory_space<vmem>>, vector<16x1xf32>
    tpu.vector_store %arg5[%c0_3, %c0_4], %5 {strides = array<i32>} : memref<16x1xf32, #tpu.memory_space<vmem>>, vector<16x1xf32>,
    %c0_5 = arith.constant 0 : index
    %c0_6 = arith.constant 0 : index
    %7 = vector.load %arg5[%c0_5, %c0_6] : memref<16x1xf32, #tpu.memory_space<vmem>>, vector<16x1xf32>
    %c0_7 = arith.constant 0 : index
    %c0_8 = arith.constant 0 : index
    %8 = vector.load %arg2[%c0_7, %c0_8] : memref<4x16xf32, #tpu.memory_space<vmem>>, vector<4x16xf32>
    %cst_9 = arith.constant dense<0.000000e+00> : vector<4x1xf32>
    %9 = tpu.matmul %8, %7, %cst_9 {dimension_numbers = #tpu.dot_dimension_numbers<[1], [0], [0], [1], [0, 0, 1, 1], [], []>} : vector<4x16xf32>, vector<16x1xf32>, vector<4x1xf32> -> vector<4x1xf32>
    %cst_10 = arith.constant 0.000000e+00 : f32
    %10 = vector.broadcast %cst_10 : f32 to vector<4x1xf32>
    %11 = arith.maximumf %9, %10 : vector<4x1xf32>
    %c0_11 = arith.constant 0 : index
    %c0_12 = arith.constant 0 : index
    %12 = vector.load %arg3[%c0_11, %c0_12] : memref<16x4xf32, #tpu.memory_space<vmem>>, vector<16x4xf32>
    %cst_13 = arith.constant dense<0.000000e+00> : vector<16x1xf32>
    %13 = tpu.matmul %12, %11, %cst_13 {dimension_numbers = #tpu.dot_dimension_numbers<[1], [0], [0], [1], [0, 0, 1, 1], [], []>} : vector<16x4xf32>, vector<4x1xf32>, vector<16x1xf32> -> vector<16x1xf32>
    %14 = arith.negf %13 : vector<16x1xf32>
    %15 = math.exp %14 : vector<16x1xf32>
    %cst_14 = arith.constant 1.000000e+00 : f32
    %16 = vector.broadcast %cst_14 : f32 to vector<16x1xf32>
    %17 = arith.addf %16, %15 : vector<16x1xf32>
    %18 = arith.divf %16, %17 : vector<16x1xf32>
    %c0_15 = arith.constant 0 : index
    %c0_16 = arith.constant 0 : index
    %19 = vector.load %arg5[%c0_15, %c0_16] : memref<16x1xf32, #tpu.memory_space<vmem>>, vector<16x1xf32>
    tpu.vector_store %arg5[%c0_15, %c0_16], %18 {strides = array<i32>} : memref<16x1xf32, #tpu.memory_space<vmem>>, vector<16x1xf32>,
    %c0_17 = arith.constant 0 : index
    %c0_18 = arith.constant 0 : index
    %c0_19 = arith.constant 0 : index
    %20 = vector.load %arg1[%c0_17, %c0_18, %c0_19] : memref<1x16x64xf32, #tpu.memory_space<vmem>>, vector<1x16x64xf32>
    %21 = vector.shape_cast %20 : vector<1x16x64xf32> to vector<16x64xf32>
    %c0_20 = arith.constant 0 : index
    %c0_21 = arith.constant 0 : index
    %22 = vector.load %arg5[%c0_20, %c0_21] : memref<16x1xf32, #tpu.memory_space<vmem>>, vector<16x1xf32>
    %23 = vector.broadcast %22 : vector<16x1xf32> to vector<16x64xf32>
    %24 = arith.mulf %21, %23 : vector<16x64xf32>
    %c0_22 = arith.constant 0 : index
    %c0_23 = arith.constant 0 : index
    %c0_24 = arith.constant 0 : index
    %25 = vector.load %arg4[%c0_22, %c0_23, %c0_24] : memref<1x16x64xf32, #tpu.memory_space<vmem>>, vector<1x16x64xf32>
    %26 = vector.shape_cast %25 : vector<1x16x64xf32> to vector<16x64xf32>
    %27 = vector.shape_cast %24 : vector<16x64xf32> to vector<1x16x64xf32>
    tpu.vector_store %arg4[%c0_22, %c0_23, %c0_24], %27 {strides = array<i32>} : memref<1x16x64xf32, #tpu.memory_space<vmem>>, vector<1x16x64xf32>,
    return
  }
  func.func @transform_0(%arg0: i32) -> (i32, i32, i32) {
    %c0_i32 = arith.constant 0 : i32
    %c0_i32_0 = arith.constant 0 : i32
    %c0_i32_1 = arith.constant 0 : i32
    return %arg0, %c0_i32, %c0_i32_0 : i32, i32, i32
  }
  func.func @transform_1(%arg0: i32) -> (i32, i32) {
    %c0_i32 = arith.constant 0 : i32
    %c0_i32_0 = arith.constant 0 : i32
    %c0_i32_1 = arith.constant 0 : i32
    return %c0_i32, %c0_i32_0 : i32, i32
  }
  func.func @transform_2(%arg0: i32) -> (i32, i32) {
    %c0_i32 = arith.constant 0 : i32
    %c0_i32_0 = arith.constant 0 : i32
    %c0_i32_1 = arith.constant 0 : i32
    return %c0_i32, %c0_i32_0 : i32, i32
  }
  func.func @transform_3(%arg0: i32) -> (i32, i32, i32) {
    %c0_i32 = arith.constant 0 : i32
    %c0_i32_0 = arith.constant 0 : i32
    %c0_i32_1 = arith.constant 0 : i32
    return %arg0, %c0_i32, %c0_i32_0 : i32, i32, i32
  }
}

</mosaic_0001>

<bundles_post_ra>
// kernel: tpu_custom_call.1
= control target key start
LH: loop header
LB: loop body
LE: loop exit
PB: predicated region body
PF: predicated region fallthrough
CT: control target
= control target key end

     0   :  { %8 = vsyncpa [#allocation4], 0  ;;  %s910_s0 = inlined_call_operand.hbm [shape: f32[2,16,64], index: 0, kind: input, shape index: {}]   ;;  %s911_s1 = inlined_call_operand.vmem [shape: f32[4,16], index: 1, kind: input, shape index: {}]   ;;  %s912_s2 = inlined_call_operand.vmem [shape: f32[16,4], index: 2, kind: input, shape index: {}]   ;;  %s913_s3 = inlined_call_operand.hbm [shape: f32[2,16,64], index: 3, kind: output, shape index: {}]  }
   0x1   :  { %10 = vsyncpa [#allocation4 + $0x1], 0 }
   0x2   :  { %11 = vsyncpa [#allocation5], 0 }
   0x3   :  { %13 = vsyncpa [#allocation5 + $0x1], 0  ;;  %s723_s12 = smov 0   ;;  %s725_s13 = smov 0  }
   0x4   :  { %s727_s14 = smov 0   ;;  %s729_s15 = smov 0  }
   0x5 LB: > { %s744_s16 = sadd.s32 4294967295, %s691_s15   ;;  %s488_s17 = sadd.s32 4294967294, %s691_s15   ;;  %s691_s15 = sphi %s729_s15, %s926_s15   ;;  %s687_s14 = sphi %s727_s14, %s925_s14   ;;  %s683_s13 = sphi %s725_s13, %s924_s13   ;;  %s679_s12 = sphi %s723_s12, %s923_s12  }
   0x6   : > { %s748_s18 = sadd.s32 1, %s691_s15   ;;  %s26_s19 = sadd.s32 1, %s687_s14 }
   0x7   : > { %s23_s20 = ssub.s32 %s691_s15, %s748_s18  ;;  %p33_p0 = scmp.ne.s32.totalorder %s687_s14, %s683_s13 }
   0x8   : > { %p24_p1 = scmp.eq.s32.totalorder %s23_s20, 0  ;;  %p34_p2 = scmp.eq.s32.totalorder %s691_s15, 0 }
   0x9   : > { %p39_p3 = scmp.ne.s32.totalorder %s683_s13, %s679_s12  ;;  %p40_p4 = scmp.eq.s32.totalorder %s744_s16, 0 }
   0xa   : > { %s760_s21 = scalar_select %p24_p1, %s687_s14, %s26_s19  }
   0xb   : > { %p762_p5 = por %p34_p2, %p33_p0  ;;  %p766_p6 = por %p40_p4, %p39_p3 }
   0xc   : > { %p105_p7 = scmp.eq.s32.totalorder %s744_s16, 1  ;;  %p111_p8 = scmp.eq.s32.totalorder %s488_s17, 1 }
   0xd   : > { %p543_p10 = scmp.lt.s32.totalorder %s691_s15, 2  ;;  %s137_s26 = sand.u32 1, %s687_s14  }
   0xe   : > { %p773_p11 = por %p105_p7, %p33_p0  ;;  %p777_p12 = por %p111_p8, %p39_p3 }
   0xf   : > { %s508_s27 = sshll.u32 %s691_s15, 8  ;;  %s491_s28 = sshll.u32 %s137_s26, 4 }
  0x10   : > { %s917_s24 = scalar_select %p773_p11, 1, 0 }
  0x11   : > { %s918_s25 = scalar_select %p777_p12, 1, 0 }
  0x12   : > { %s786_s4 = scalar_lea.hbm %s910_s0, %s508_s27  ;;  %s141_s5 = scalar_lea.vmem [#allocation3], %s491_s28 }
  0x13   : > { %s148_s6 = sshll.u32 %s141_s5, 4  ;;  %p790_p13 = pnand %p543_p10, %p762_p5  ;;  %s794_s6 = int_to_ptr.vmem [resolvable:$true] %s148_s6 }
  0x14   : > { %s796_s8 = scalar_lea.sflag [#allocation4], %s137_s26  ;;  %s595_s9 = scalar_lea.hbm %s786_s4, 256 }
  0x15   : > { %p596_p0 = scmp.ne.s32.totalorder %s786_s4, %s595_s9  ;;  %p597_p1 = pneg %p790_p13 }
  0x16   : > { %s600_s17 = scalar_lea.hbm %s910_s0, 512  ;;  %p601_p4 = scmp.lt.u32.totalorder %s786_s4, %s910_s0 }
  0x17   : > { %p598_p2 = pnand %p597_p1, %p596_p0  ;;  %p602_p5 = scmp.lt.u32.totalorder %s600_s17, %s595_s9 }
  0x18   : > { %p604_p8 = scmp.lt.u32.totalorder %s595_s9, %s786_s4 }
  0x19   : > { %p599_p3 = pneg %p598_p2  ;;  %p603_p7 = por %p602_p5, %p601_p4 }
  0x1b   : > { %p605_p10 = por %p604_p8, %p603_p7 }
  0x1d   : > { %p606_p9 = pnand %p605_p10, %p599_p3 }
  0x1f   : > { %609 = shalt.err (!%p606_p9)
}
  0x20   : > { %s610_s22 = scalar_lea.vmem %s794_s6, 256  ;;  %s693_s26 = smov [#allocation3]  }
  0x21   : > { %p611_p0 = scmp.ne.s32.totalorder %s794_s6, %s610_s22  ;;  %s615_s27 = sshll.u32 %s693_s26, 4  ;;  %s616_s27 = int_to_ptr.vmem [resolvable:$false] %s615_s27 }
  0x22   : > { %s617_s28 = scalar_lea.vmem %s616_s27, 512  ;;  %p618_p11 = scmp.lt.s32.totalorder %s794_s6, %s616_s27 }
  0x23   : > { %p613_p2 = pnand %p611_p0, %p597_p1  ;;  %p619_p4 = scmp.lt.s32.totalorder %s617_s28, %s610_s22 }
  0x25   : > { %p614_p12 = pneg %p613_p2  ;;  %p620_p5 = por %p619_p4, %p618_p11 }
  0x27   : > { %p621_p7 = pnand %p620_p5, %p614_p12 }
  0x29   : > { %624 = shalt.err (!%p621_p7)
}
  0x2a   : > { %s694_s29 = smov 128   ;;  %s695_s30 = smov 8  }
  0x2b   : > { %538 = dma.hbm_to_vmem [thread:$0]  (!%p790_p13), %s786_s4, 256, %s794_s6, %s796_s8, %s694_s29, %s694_s29, %s695_s30  }
  0x2c   : > { %p494_p9 = scmp.ge.s32.totalorder %s691_s15, 1  ;;  %p156_p1 = scmp.lt.s32.totalorder %s691_s15, 3 }
  0x2e   : > { %p157_p3 = pnand %p494_p9, %p156_p1 }
  0x2f   : > { %s827_s5 = sand.u32 (!%p157_p3), 1, %s683_s13  }
  0x30   : > { %160 = sbr.rel (%p157_p3) target bundleno = 831 (0x33f), region = 32  ;;  %s495_s9 = sshll.u32 (!%p157_p3), %s827_s5, 4 }
  0x31   : > { %s163_s10 = scalar_lea.sflag (!%p157_p3), [#allocation4], %s827_s5  ;;  %s166_s11 = scalar_lea.vmem (!%p157_p3), [#allocation3], %s495_s9 }
  0x37   : > { %670 = dma.done.wait (%p766_p6), %s163_s10, 256  }
  0x38   : > { %672 = vsyncadd (%p766_p6), %s163_s10, 4294967040  ;;  %vm191_vm0 = vcmask 523264   ;;  %v189_v0 = vld [vmem:[%s166_s11] sm:$0xff]  ;;  %v837_v1 = vld [vmem:[%s166_s11 + $0x8] sm:$0xff]  ;;  %v696_v4 = vmov 0.0|0.0   ;;  %vm697_vm1 = vmmov 0  }
  0x39   : > { %v192_v2 = vsel %vm191_vm0, %v189_v0, 0.0  ;;  %v195_v3 = vsel %vm191_vm0, %v837_v1, 0.0  ;;  %528 = vmatprep.subr.bf16.mxu0 %v696_v4  ;;  %v698_v5 = vmov 0.0   ;;  %vm200_vm2 = vcmask 7168   ;;  %v205_v13 = vld [vmem:[%s911_s1] sm:$0xf] }
  0x3a   : > { %193 = vadd.xlane.f32.xlu0 %v192_v2  ;;  %520 = vmatprep.mubr.msk.f32.mxu0 %vm697_vm1, %v698_v5  ;;  %vm206_vm3 = vcmask 130048   ;;  %v281_v14 = vld [vmem:[%s912_s2] sm:$0xff]  ;;  %vm283_vm4 = vcmask 31744   ;;  %vm290_vm5 = vcmask 1043456   ;;  %v282_v18 = vld [vmem:[%s912_s2 + $0x8] sm:$0xff]  ;;  %v699_v19 = vmov 0  }
  0x3b   : > { %525 = vmatprep.mubr.msk.f32.mxu1 %vm283_vm4, %v281_v14  ;;  %585 = vset.pattern.permute.xlu1 %v699_v19  ;;  %s188_s19 = scalar_lea.vmem [#allocation6], %s495_s9  ;;  %s509_s22 = sshll.u32 %s744_s16, 8 }
  0x3c   : > { %586 = vset.pattern.permute.xlu0 %v699_v19  ;;  %s415_s20 = sshll.u32 %s188_s19, 4  ;;  %s864_s28 = scalar_lea.hbm %s913_s3, %s509_s22  ;;  %s858_s20 = int_to_ptr.vmem [resolvable:$true] %s415_s20 }
  0x3d   : > { %s402_s29 = scalar_lea.sflag [#allocation5], %s827_s5  ;;  %s625_s30 = scalar_lea.vmem %s858_s20, 256 }
  0x3e   : > { %196 = vadd.xlane.f32.xlu0 %v195_v3  ;;  %p626_p6 = scmp.ne.s32.totalorder %s858_s20, %s625_s30  ;;  %p920_p11 = scmp.ne.s32.totalorder %s917_s24, 0 }
  0x3f   : > { %s700_s16 = smov [#allocation6]  }
  0x40   : > { %p627_p12 = pnand %p626_p6, %p920_p11  ;;  %s629_s9 = sshll.u32 %s700_s16, 4  ;;  %s630_s9 = int_to_ptr.vmem [resolvable:$false] %s629_s9 }
  0x41   : > { %s631_s10 = scalar_lea.vmem %s630_s9, 512  ;;  %p632_p8 = scmp.lt.s32.totalorder %s858_s20, %s630_s9 }
  0x42   : > { %p628_p13 = pneg %p627_p12  ;;  %p633_p10 = scmp.lt.s32.totalorder %s631_s10, %s625_s30 }
  0x44   : > { %p634_p0 = por %p633_p10, %p632_p8 }
  0x46   : > { %p635_p2 = pnand %p634_p0, %p628_p13 }
  0xc7   : > { %v194_v6 = vpop.xlane.xlu0 %193 }
  0xc8   : > { %v198_v7 = vmul.f32 0.015625, %v194_v6 }
  0xca   : > { %201 = vst.msk [vmem:[#allocation2] sm:$0xff] %vm200_vm2, %v198_v7 }
  0xcb   : > { %v197_v8 = vpop.xlane.xlu0 %196 }
  0xcc   : > { %v199_v9 = vmul.f32 0.015625, %v197_v8 }
  0xce   : > { %202 = vst.msk [vmem:[#allocation2 + $0x8] sm:$0xff] %vm200_vm2, %v199_v9 }
  0xd1   : > { %v203_v10 = vld [vmem:[#allocation2] sm:$0xff] }
  0xd5   : > { %v204_v11 = vld [vmem:[#allocation2 + $0x8] sm:$0xff] }
  0xd6   : > { %v529_v12 = vpack.c.bf16 %v204_v11, %v203_v10 }
  0xd8   : > { %530 = vmatpush3.bf16.msra.mxu0 %v529_v12 }
  0xdb   : > { %521 = vmatmul.mubr.msk.f32.vlgmr.msra.gmra.mrb[0].mxu0 %vm206_vm3, %v205_v13 }
 0x1ae   : > { %v276_v15 = vpop.f32.mrb[0].mxu0 }
 0x1af   : > { %v280_v16 = vmax.f32 %v276_v15, 0.0  ;;  %v522_v17 = vpop.f32.mrb[1].mxu0 }
 0x1b1   : > { %523 = vmatprep.subr.msk.mxu1 %vm290_vm5, %v280_v16 }
 0x1b2   : > { %524 = vmatpush3.msk.msra.mxu1 %vm290_vm5, %v280_v16 }
 0x1b3   : > { %526 = vmatmul.mubr.msk.f32.vlgmr.msra.gmra.mrb[0].mxu1 %vm283_vm4, %v282_v18 }
 0x286   : > { %v527_v20 = vpop.f32.mrb[0].mxu1 }
 0x287   : > { %v502_v21 = vmul.f32 -1.442695, %v527_v20  ;;  %v360_v22 = vpop.f32.mrb[1].mxu1 }
 0x288   : > { %v501_v23 = vmul.f32 -1.442695, %v360_v22 }
 0x289   : > { %587 = vpow2.f32 %v502_v21 }
 0x28a   : > { %589 = vpow2.f32 %v501_v23 }
 0x293   : > { %v588_v24 = vpop.eup %587 }
 0x294   : > { %v590_v25 = vpop.eup %589  ;;  %v376_v26 = vadd.f32 1.0, %v588_v24 }
 0x295   : > { %v375_v27 = vadd.f32 1.0, %v590_v25 }
 0x296   : > { %591 = vrcp.f32 %v376_v26 }
 0x297   : > { %593 = vrcp.f32 %v375_v27 }
 0x2a0   : > { %v592_v28 = vpop.eup %591 }
 0x2a1   : > { %v594_v29 = vpop.eup %593  ;;  %382 = vst.msk [vmem:[#allocation2 + $0x8] sm:$0xff] %vm200_vm2, %v592_v28 }
 0x2a2   : > { %381 = vst.msk [vmem:[#allocation2] sm:$0xff] %vm200_vm2, %v594_v29 }
 0x2a8   : > { %v386_v31 = vld [vmem:[#allocation2 + $0x8] sm:$0xff] }
 0x2a9   : > { %v385_v30 = vld [vmem:[#allocation2] sm:$0xff] }
 0x2aa   : > { %389 = vperm.xlu1 %585, %v385_v30  }
 0x2ae   : > { %394 = vperm.xlu1 %585, %v386_v31  }
 0x329   : > { %v390_v32 = vpop.permute.xlu1 %389 }
 0x32a   : > { %v397_v33 = vmul.f32 %v390_v32, %v189_v0 }
 0x32c   : > { %399 = vst.msk [vmem:[%s188_s19] sm:$0xff] %vm191_vm0, %v397_v33 }
 0x32d   : > { %v395_v34 = vpop.permute.xlu1 %394 }
 0x32e   : > { %v398_v35 = vmul.f32 %v395_v34, %v837_v1 }
 0x330   : > { %400 = vst.msk [vmem:[%s188_s19 + $0x8] sm:$0xff] %vm191_vm0, %v398_v35 }
 0x331   : > { %638 = shalt.err (!%p635_p2)
}
 0x332   : > { %s639_s11 = scalar_lea.hbm %s864_s28, 256  ;;  %s643_s6 = scalar_lea.hbm %s913_s3, 512 }
 0x333   : > { %p640_p4 = scmp.ne.s32.totalorder %s864_s28, %s639_s11  ;;  %p644_p9 = scmp.lt.u32.totalorder %s864_s28, %s913_s3 }
 0x334   : > { %p645_p1 = scmp.lt.u32.totalorder %s643_s6, %s639_s11  ;;  %p647_p6 = scmp.lt.u32.totalorder %s639_s11, %s864_s28 }
 0x335   : > { %p641_p5 = pnand %p640_p4, %p920_p11 }
 0x336   : > { %p646_p3 = por %p645_p1, %p644_p9 }
 0x337   : > { %p642_p7 = pneg %p641_p5 }
 0x338   : > { %p648_p12 = por %p647_p6, %p646_p3 }
 0x33a   : > { %p649_p13 = pnand %p648_p12, %p642_p7 }
 0x33c   : > { %652 = shalt.err (!%p649_p13)
}
 0x33d   : > { %s701_s17 = smov 128   ;;  %s702_s19 = smov 8  }
 0x33e   : > { %533 = dma.vmem_to_hbm [thread:$0]  (%p920_p11), %s858_s20, 256, %s864_s28, %s402_s29, %s701_s17, %s701_s17, %s702_s19  }
 0x33f PF: > { %s430_s22 = sand.u32 1, %s679_s12   ;;  %p921_p8 = scmp.ne.s32.totalorder %s918_s25, 0 }
 0x340   : > { %p922_p10 = scmp.ge.s32.totalorder %s691_s15, 2  ;;  %s431_s26 = scalar_lea.sflag [#allocation5], %s430_s22 }
 0x342   : > { %p540_p0 = pnand %p922_p10, %p921_p8 }
 0x344   : > { %674 = dma.done.wait (!%p540_p0), %s431_s26, 256  }
 0x345   : > { %676 = vsyncadd (!%p540_p0), %s431_s26, 4294967040  ;;  %p16_p2 = scmp.ge.s32.totalorder %s748_s18, 4   ;;  %s923_s12 = smov %s683_s13 }
 0x346   : > { %s924_s13 = smov %s687_s14  ;;  %s925_s14 = smov %s760_s21 }
 0x347   : > { %s926_s15 = smov %s748_s18  ;;  %18 = sbr.rel (!%p16_p2) target bundleno = 5 (0x5), region = 77 }
 0x34e   :  { %436 = vsyncpa [#allocation4], 1 }
 0x34f   :  { %438 = vsyncpa [#allocation4 + $0x1], 1 }
 0x350   :  { %439 = vsyncpa [#allocation5], 1 }
 0x351   :  { %441 = vsyncpa [#allocation5 + $0x1], 1 }

</bundles_post_ra>
